<compile_context>
chip_gen: v7x
topology: tpu7x:2x2x1
jax: 0.10.0
libtpu: 0.0.40
codegen_flags: <defaults>
</compile_context>

<pallas_src>
import functools

import jax
import jax.numpy as jnp
from jax.experimental import pallas as pl
from jax.experimental.pallas import tpu as pltpu


def _cdiv(a, b):
    return -(-a // b)


def _round_up(x, m):
    return ((x + m - 1) // m) * m


def _has_low_precision_valu():
    """v6e / v7x have bf16 VPU+EUP; v5-and-older do not."""
    try:
        kind = jax.devices()[0].device_kind.lower()
    except Exception:
        return True
    return not any(t in kind for t in ("v2", "v3", "v4", "v5"))


def _loss_kernel(logits_ref, y_ref, zmean_ref, zlogvar_ref, out_ref,
                 m_sc, l_sc, sel_sc, *,
                 tile_n, tile_v, n_valid, v_valid, cast_up):
    """Row-tile x vocab-chunk step of sum_i [logsumexp(logits_i) - logits_i[y_i]],
    with the KL term folded into the final write of row-tile 0."""
    i = pl.program_id(0)              # row-tile index   ("parallel")
    j = pl.program_id(1)              # vocab-chunk index ("arbitrary", innermost)
    nv = pl.num_programs(1)

    # --- init running accumulators at the first vocab chunk -------------------
    @pl.when(j == 0)
    def _():
        m_sc[...] = jnp.full(m_sc.shape, -jnp.inf, dtype=jnp.float32)
        l_sc[...] = jnp.zeros(l_sc.shape, dtype=jnp.float32)
        sel_sc[...] = jnp.zeros(sel_sc.shape, dtype=jnp.float32)

    logits = logits_ref[...]                              # (tile_n, tile_v)
    if cast_up:                                           # v5-class: one widening
        logits = logits.astype(jnp.float32)
    y = y_ref[...]                                        # (tile_n, 1) int32

    col = j * tile_v + jax.lax.broadcasted_iota(jnp.int32, logits.shape, 1)

    # Mask out-of-range vocab columns of a partial last V chunk (static branch).
    if v_valid % tile_v != 0:
        logits = jnp.where(col < v_valid, logits,
                           jnp.array(-jnp.inf, dtype=logits.dtype))

    # Selected logit for this chunk (exact in input dtype: sum of zeros + one).
    zero = jnp.array(0, dtype=logits.dtype)
    sel = jnp.sum(jnp.where(col == y, logits, zero), axis=-1, keepdims=True)
    sel_sc[...] += sel.astype(jnp.float32)

    # Online logsumexp across vocab chunks (max exact in input dtype; exp in f32).
    m_chunk = jnp.max(logits, axis=-1, keepdims=True).astype(jnp.float32)
    m_new = jnp.maximum(m_sc[...], m_chunk)
    l_sc[...] = (l_sc[...] * jnp.exp(m_sc[...] - m_new)
                 + jnp.sum(jnp.exp(logits - m_new), axis=-1, keepdims=True))
    m_sc[...] = m_new

    # --- finalize at the last vocab chunk -------------------------------------
    @pl.when(j == nv - 1)
    def _():
        row = i * tile_n + jax.lax.broadcasted_iota(jnp.int32, (tile_n, 1), 0)
        ce = m_sc[...] + jnp.log(l_sc[...]) - sel_sc[...]
        # Select (not multiply): garbage rows from the partial last block cannot
        # propagate NaN/Inf into the sum.
        recon_partial = jnp.sum(jnp.where(row < n_valid, ce, 0.0))

        # KL term, emitted once (row-tile 0 only); z_* are tiny resident inputs.
        zm = zmean_ref[...].astype(jnp.float32)
        zl = zlogvar_ref[...].astype(jnp.float32)
        kl_full = -0.5 * jnp.sum(1.0 + zl - zm * zm - jnp.exp(zl))
        kl_val = jnp.where(i == 0, kl_full, 0.0)

        # Lane-dense (1, 8, 128) block: sublane 0 = recon partial, sublane 1+ = KL.
        subl = jax.lax.broadcasted_iota(jnp.int32, (1, 8, 128), 1)
        out_ref[...] = jnp.where(subl == 0, recon_partial, kl_val)


def vae_loss(x_hat, y, z_mean, z_logvar, *, tile_n=None, tile_v=None):
    """x_hat: (B, S, V) float logits (f32 or bf16); y: (B, S) int class ids;
    z_mean / z_logvar: (B, D) float. Returns (recon_loss, kl_loss) f32 scalars.
    """
    b, s, v = x_hat.shape
    n = b * s
    itemsize = jnp.dtype(x_hat.dtype).itemsize
    # Sublane multiple (8 for f32, 16 for bf16, ...) keeps blocks well laid out.
    sublane = 8 * max(1, 4 // itemsize)

    # --- vocab chunking (online logsumexp) ------------------------------------
    if tile_v is None:
        # Keep each chunk row <= ~8 KiB so a ~2 MiB tile still has many rows.
        max_chunk_elems = (8 * 1024) // itemsize          # 2048 f32 / 4096 bf16
        tile_v = v if v <= max_chunk_elems else max_chunk_elems  # mult of 128
    tile_v = int(tile_v)
    num_v_tiles = _cdiv(v, tile_v)

    # --- row tiling: sized by bytes (~2 MiB per logits tile) ------------------
    if tile_n is None:
        target_tile_bytes = 2 * 1024 * 1024
        tile_n = max(1, target_tile_bytes // max(1, tile_v * itemsize))
    tile_n = int(tile_n)
    tile_n -= tile_n % sublane
    tile_n = max(sublane, tile_n)
    # Keep >= ~4 row tiles when possible so the "parallel" axis feeds both
    # TensorCores on v7x.
    parallel_cap = _round_up(_cdiv(n, 4), sublane)
    tile_n = max(sublane, min(tile_n, parallel_cap))
    num_row_tiles = _cdiv(n, tile_n)

    # No padding copy: partial last row block is read directly and masked.
    logits2d = x_hat.reshape(n, v)
    y2d = y.reshape(n, 1).astype(jnp.int32)

    # f32 compute path on chips without bf16 VALU/EUP (v5e and older).
    cast_up = (itemsize >= 4) or (not _has_low_precision_valu())

    # Explicit VMEM budget: 2 pipeline buffers of the input tile plus ~3 f32
    # tile-sized temporaries; capped well below v7x's 64 MiB physical VMEM.
    tile_in_bytes = tile_n * tile_v * itemsize
    tile_f32_bytes = tile_n * tile_v * 4
    vmem_limit = int(min(40 * 1024 * 1024,
                         max(16 * 1024 * 1024,
                             2 * tile_in_bytes + 3 * tile_f32_bytes + (4 << 20))))

    cost = pl.CostEstimate(
        flops=int(6 * n * v + 8 * z_mean.size),
        transcendentals=int(n * v + n + z_mean.size),
        bytes_accessed=int(n * v * itemsize + n * 4
                           + num_row_tiles * 8 * 128 * 4
                           + 2 * z_mean.size * jnp.dtype(z_mean.dtype).itemsize),
    )

    kernel = functools.partial(
        _loss_kernel, tile_n=tile_n, tile_v=tile_v,
        n_valid=n, v_valid=v, cast_up=cast_up)

    partials = pl.pallas_call(
        kernel,
        out_shape=jax.ShapeDtypeStruct((num_row_tiles, 8, 128), jnp.float32),
        grid=(num_row_tiles, num_v_tiles),
        in_specs=[
            pl.BlockSpec((tile_n, tile_v), lambda i, j: (i, j)),
            pl.BlockSpec((tile_n, 1), lambda i, j: (i, 0)),
            pl.BlockSpec(z_mean.shape, lambda i, j: (0, 0)),      # resident
            pl.BlockSpec(z_logvar.shape, lambda i, j: (0, 0)),    # resident
        ],
        out_specs=pl.BlockSpec((1, 8, 128), lambda i, j: (i, 0, 0)),
        scratch_shapes=[
            pltpu.VMEM((tile_n, 1), jnp.float32),   # running max
            pltpu.VMEM((tile_n, 1), jnp.float32),   # running denominator
            pltpu.VMEM((tile_n, 1), jnp.float32),   # selected-logit accumulator
        ],
        compiler_params=pltpu.CompilerParams(
            dimension_semantics=("parallel", "arbitrary"),
            vmem_limit_bytes=vmem_limit,
        ),
        cost_estimate=cost,
    )(logits2d, y2d, z_mean, z_logvar)

    recon = jnp.sum(partials[:, 0, 0])
    kl = partials[0, 1, 0]
    return recon, kl


if __name__ == "__main__":
    key = jax.random.PRNGKey(0)

    def reference(x_hat, y, z_mean, z_logvar):
        logp = jax.nn.log_softmax(x_hat.astype(jnp.float32), axis=-1)
        recon = -jnp.sum(jnp.take_along_axis(logp, y[..., None], axis=-1))
        zm = z_mean.astype(jnp.float32)
        zl = z_logvar.astype(jnp.float32)
        kl = -0.5 * jnp.sum(1.0 + zl - zm ** 2 - jnp.exp(zl))
        return recon, kl

    # Cases exercise: single tile / full vocab; non-divisible row count with a
    # forced small tile (partial last row block, no padding copy); vocab
    # chunking with a partial last V chunk; and a bf16 logits path.
    cases = (
        ((2, 8, 32, 16), jnp.float32, None, None),
        ((2, 9, 32, 16), jnp.float32, 8, None),
        ((2, 9, 320, 16), jnp.float32, 8, 128),
        ((2, 8, 32, 16), jnp.bfloat16, None, None),
    )
    for (B, S, V, D), dtype, tn, tv in cases:
        k1, k2, k3, k4, key = jax.random.split(key, 5)
        x_hat = jax.random.normal(k1, (B, S, V), dtype=jnp.float32).astype(dtype)
        y = jax.random.randint(k2, (B, S), 0, V, dtype=jnp.int32)
        z_mean = jax.random.normal(k3, (B, D), dtype=jnp.float32)
        z_logvar = 0.1 * jax.random.normal(k4, (B, D), dtype=jnp.float32)

        recon, kl = vae_loss(x_hat, y, z_mean, z_logvar, tile_n=tn, tile_v=tv)
        jax.block_until_ready((recon, kl))

        recon_ref, kl_ref = reference(x_hat, y, z_mean, z_logvar)
        assert jnp.allclose(recon, recon_ref, rtol=1e-4, atol=1e-3), (
            dtype, recon, recon_ref)
        assert jnp.allclose(kl, kl_ref, rtol=1e-4, atol=1e-3), (
            dtype, kl, kl_ref)

    print("KERNEL_OK")
</pallas_src>

<mosaic_0001>
module attributes {stable_mosaic.version = 11 : i64} {
  func.func @_loss_kernel(%arg0: i32, %arg1: i32, %arg2: memref<8x32xf32, #tpu.memory_space<vmem>>, %arg3: memref<8x1xi32, #tpu.memory_space<vmem>>, %arg4: memref<2x16xf32, #tpu.memory_space<vmem>>, %arg5: memref<2x16xf32, #tpu.memory_space<vmem>>, %arg6: memref<1x8x128xf32, #tpu.memory_space<vmem>>, %arg7: memref<8x1xf32, #tpu.memory_space<vmem>>, %arg8: memref<8x1xf32, #tpu.memory_space<vmem>>, %arg9: memref<8x1xf32, #tpu.memory_space<vmem>>) attributes {dimension_semantics = [#tpu.dimension_semantics<parallel>, #tpu.dimension_semantics<arbitrary>], iteration_bounds = array<i64: 2, 1>, scalar_prefetch = 0 : i64, scratch_operands = 3 : i64, tpu.core_type = #tpu.core_type<tc>, window_params = [{transform_indices = @transform_0, window_bounds = array<i64: 8, 32>}, {transform_indices = @transform_1, window_bounds = array<i64: 8, 1>}, {pipeline_mode = #tpu.pipeline_mode<synchronous>, transform_indices = @transform_2, window_bounds = array<i64: 2, 16>}, {pipeline_mode = #tpu.pipeline_mode<synchronous>, transform_indices = @transform_3, window_bounds = array<i64: 2, 16>}, {transform_indices = @transform_4, window_bounds = array<i64: 1, 8, 128>}]} {
    %c0_i32 = arith.constant 0 : i32
    %0 = arith.cmpi eq, %arg1, %c0_i32 : i32
    %1 = arith.extui %0 : i1 to i32
    %c0_i32_0 = arith.constant 0 : i32
    %2 = arith.cmpi ne, %1, %c0_i32_0 : i32
    scf.if %2 {
      %cst_23 = arith.constant 0xFF800000 : f32
      %38 = vector.broadcast %cst_23 : f32 to vector<8x1xf32>
      %c0_24 = arith.constant 0 : index
      %c0_25 = arith.constant 0 : index
      %39 = vector.load %arg7[%c0_24, %c0_25] : memref<8x1xf32, #tpu.memory_space<vmem>>, vector<8x1xf32>
      tpu.vector_store %arg7[%c0_24, %c0_25], %38 {strides = array<i32>} : memref<8x1xf32, #tpu.memory_space<vmem>>, vector<8x1xf32>,
      %cst_26 = arith.constant 0.000000e+00 : f32
      %40 = vector.broadcast %cst_26 : f32 to vector<8x1xf32>
      %c0_27 = arith.constant 0 : index
      %c0_28 = arith.constant 0 : index
      %41 = vector.load %arg8[%c0_27, %c0_28] : memref<8x1xf32, #tpu.memory_space<vmem>>, vector<8x1xf32>
      tpu.vector_store %arg8[%c0_27, %c0_28], %40 {strides = array<i32>} : memref<8x1xf32, #tpu.memory_space<vmem>>, vector<8x1xf32>,
      %cst_29 = arith.constant 0.000000e+00 : f32
      %42 = vector.broadcast %cst_29 : f32 to vector<8x1xf32>
      %c0_30 = arith.constant 0 : index
      %c0_31 = arith.constant 0 : index
      %43 = vector.load %arg9[%c0_30, %c0_31] : memref<8x1xf32, #tpu.memory_space<vmem>>, vector<8x1xf32>
      tpu.vector_store %arg9[%c0_30, %c0_31], %42 {strides = array<i32>} : memref<8x1xf32, #tpu.memory_space<vmem>>, vector<8x1xf32>,
    } else {
    }
    %c0 = arith.constant 0 : index
    %c0_1 = arith.constant 0 : index
    %3 = vector.load %arg2[%c0, %c0_1] : memref<8x32xf32, #tpu.memory_space<vmem>>, vector<8x32xf32>
    %c0_2 = arith.constant 0 : index
    %c0_3 = arith.constant 0 : index
    %4 = vector.load %arg3[%c0_2, %c0_3] : memref<8x1xi32, #tpu.memory_space<vmem>>, vector<8x1xi32>
    %c32_i32 = arith.constant 32 : i32
    %5 = arith.muli %arg1, %c32_i32 : i32
    %6 = tpu.iota {dimensions = array<i32: 1>} : vector<8x32xi32>
    %7 = vector.broadcast %5 : i32 to vector<8x32xi32>
    %8 = arith.addi %7, %6 : vector<8x32xi32>
    %9 = vector.broadcast %4 : vector<8x1xi32> to vector<8x32xi32>
    %10 = arith.cmpi eq, %8, %9 : vector<8x32xi32>
    %cst = arith.constant 0.000000e+00 : f32
    %11 = vector.broadcast %cst : f32 to vector<8x32xf32>
    %12 = arith.select %10, %3, %11 : vector<8x32xi1>, vector<8x32xf32>
    %cst_4 = arith.constant dense<0.000000e+00> : vector<8xf32>
    %13 = vector.multi_reduction <add>, %12, %cst_4 [1] : vector<8x32xf32> to vector<8xf32>
    %14 = vector.shape_cast %13 : vector<8xf32> to vector<8x1xf32>
    %c0_5 = arith.constant 0 : index
    %c0_6 = arith.constant 0 : index
    %15 = vector.load %arg9[%c0_5, %c0_6] : memref<8x1xf32, #tpu.memory_space<vmem>>, vector<8x1xf32>
    %16 = arith.addf %15, %14 : vector<8x1xf32>
    %c0_7 = arith.constant 0 : index
    %c0_8 = arith.constant 0 : index
    %17 = vector.load %arg9[%c0_7, %c0_8] : memref<8x1xf32, #tpu.memory_space<vmem>>, vector<8x1xf32>
    tpu.vector_store %arg9[%c0_7, %c0_8], %16 {strides = array<i32>} : memref<8x1xf32, #tpu.memory_space<vmem>>, vector<8x1xf32>,
    %cst_9 = arith.constant dense<0xFF800000> : vector<8xf32>
    %18 = vector.multi_reduction <maximumf>, %3, %cst_9 [1] : vector<8x32xf32> to vector<8xf32>
    %19 = vector.shape_cast %18 : vector<8xf32> to vector<8x1xf32>
    %c0_10 = arith.constant 0 : index
    %c0_11 = arith.constant 0 : index
    %20 = vector.load %arg7[%c0_10, %c0_11] : memref<8x1xf32, #tpu.memory_space<vmem>>, vector<8x1xf32>
    %21 = arith.maximumf %20, %19 : vector<8x1xf32>
    %c0_12 = arith.constant 0 : index
    %c0_13 = arith.constant 0 : index
    %22 = vector.load %arg8[%c0_12, %c0_13] : memref<8x1xf32, #tpu.memory_space<vmem>>, vector<8x1xf32>
    %c0_14 = arith.constant 0 : index
    %c0_15 = arith.constant 0 : index
    %23 = vector.load %arg7[%c0_14, %c0_15] : memref<8x1xf32, #tpu.memory_space<vmem>>, vector<8x1xf32>
    %24 = arith.subf %23, %21 : vector<8x1xf32>
    %25 = math.exp %24 : vector<8x1xf32>
    %26 = arith.mulf %22, %25 : vector<8x1xf32>
    %27 = vector.broadcast %21 : vector<8x1xf32> to vector<8x32xf32>
    %28 = arith.subf %3, %27 : vector<8x32xf32>
    %29 = math.exp %28 : vector<8x32xf32>
    %cst_16 = arith.constant dense<0.000000e+00> : vector<8xf32>
    %30 = vector.multi_reduction <add>, %29, %cst_16 [1] : vector<8x32xf32> to vector<8xf32>
    %31 = vector.shape_cast %30 : vector<8xf32> to vector<8x1xf32>
    %32 = arith.addf %26, %31 : vector<8x1xf32>
    %c0_17 = arith.constant 0 : index
    %c0_18 = arith.constant 0 : index
    %33 = vector.load %arg8[%c0_17, %c0_18] : memref<8x1xf32, #tpu.memory_space<vmem>>, vector<8x1xf32>
    tpu.vector_store %arg8[%c0_17, %c0_18], %32 {strides = array<i32>} : memref<8x1xf32, #tpu.memory_space<vmem>>, vector<8x1xf32>,
    %c0_19 = arith.constant 0 : index
    %c0_20 = arith.constant 0 : index
    %34 = vector.load %arg7[%c0_19, %c0_20] : memref<8x1xf32, #tpu.memory_space<vmem>>, vector<8x1xf32>
    tpu.vector_store %arg7[%c0_19, %c0_20], %21 {strides = array<i32>} : memref<8x1xf32, #tpu.memory_space<vmem>>, vector<8x1xf32>,
    %c0_i32_21 = arith.constant 0 : i32
    %35 = arith.cmpi eq, %arg1, %c0_i32_21 : i32
    %36 = arith.extui %35 : i1 to i32
    %c0_i32_22 = arith.constant 0 : i32
    %37 = arith.cmpi ne, %36, %c0_i32_22 : i32
    scf.if %37 {
      %c8_i32 = arith.constant 8 : i32
      %38 = arith.muli %arg0, %c8_i32 : i32
      %39 = tpu.iota {dimensions = array<i32: 0>} : vector<8x1xi32>
      %40 = vector.broadcast %38 : i32 to vector<8x1xi32>
      %41 = arith.addi %40, %39 : vector<8x1xi32>
      %c0_23 = arith.constant 0 : index
      %c0_24 = arith.constant 0 : index
      %42 = vector.load %arg7[%c0_23, %c0_24] : memref<8x1xf32, #tpu.memory_space<vmem>>, vector<8x1xf32>
      %c0_25 = arith.constant 0 : index
      %c0_26 = arith.constant 0 : index
      %43 = vector.load %arg8[%c0_25, %c0_26] : memref<8x1xf32, #tpu.memory_space<vmem>>, vector<8x1xf32>
      %44 = math.log %43 : vector<8x1xf32>
      %45 = arith.addf %42, %44 : vector<8x1xf32>
      %c0_27 = arith.constant 0 : index
      %c0_28 = arith.constant 0 : index
      %46 = vector.load %arg9[%c0_27, %c0_28] : memref<8x1xf32, #tpu.memory_space<vmem>>, vector<8x1xf32>
      %47 = arith.subf %45, %46 : vector<8x1xf32>
      %c16_i32 = arith.constant 16 : i32
      %48 = vector.broadcast %c16_i32 : i32 to vector<8x1xi32>
      %49 = arith.cmpi slt, %41, %48 : vector<8x1xi32>
      %cst_29 = arith.constant 0.000000e+00 : f32
      %50 = vector.broadcast %cst_29 : f32 to vector<8x1xf32>
      %51 = arith.select %49, %47, %50 : vector<8x1xi1>, vector<8x1xf32>
      %52 = vector.shape_cast %51 : vector<8x1xf32> to vector<1x8x1xf32>
      %cst_30 = arith.constant dense<0.000000e+00> : vector<1xf32>
      %53 = vector.multi_reduction <add>, %52, %cst_30 [1, 2] : vector<1x8x1xf32> to vector<1xf32>
      %54 = vector.shape_cast %53 : vector<1xf32> to vector<1x1x1xf32>
      %55 = vector.extract %54[0, 0, 0] : f32 from vector<1x1x1xf32>
      %c0_31 = arith.constant 0 : index
      %c0_32 = arith.constant 0 : index
      %56 = vector.load %arg4[%c0_31, %c0_32] : memref<2x16xf32, #tpu.memory_space<vmem>>, vector<2x16xf32>
      %c0_33 = arith.constant 0 : index
      %c0_34 = arith.constant 0 : index
      %57 = vector.load %arg5[%c0_33, %c0_34] : memref<2x16xf32, #tpu.memory_space<vmem>>, vector<2x16xf32>
      %cst_35 = arith.constant 1.000000e+00 : f32
      %58 = vector.broadcast %cst_35 : f32 to vector<2x16xf32>
      %59 = arith.addf %58, %57 : vector<2x16xf32>
      %60 = arith.mulf %56, %56 : vector<2x16xf32>
      %61 = arith.subf %59, %60 : vector<2x16xf32>
      %62 = math.exp %57 : vector<2x16xf32>
      %63 = arith.subf %61, %62 : vector<2x16xf32>
      %64 = vector.shape_cast %63 : vector<2x16xf32> to vector<1x2x16xf32>
      %cst_36 = arith.constant dense<0.000000e+00> : vector<1xf32>
      %65 = vector.multi_reduction <add>, %64, %cst_36 [1, 2] : vector<1x2x16xf32> to vector<1xf32>
      %66 = vector.shape_cast %65 : vector<1xf32> to vector<1x1x1xf32>
      %67 = vector.extract %66[0, 0, 0] : f32 from vector<1x1x1xf32>
      %cst_37 = arith.constant -5.000000e-01 : f32
      %68 = arith.mulf %cst_37, %67 : f32
      %c0_i32_38 = arith.constant 0 : i32
      %69 = arith.cmpi eq, %arg0, %c0_i32_38 : i32
      %cst_39 = arith.constant 0.000000e+00 : f32
      %70 = arith.select %69, %68, %cst_39 : f32
      %71 = tpu.iota {dimensions = array<i32: 1>} : vector<1x8x128xi32>
      %c0_i32_40 = arith.constant 0 : i32
      %72 = vector.broadcast %c0_i32_40 : i32 to vector<1x8x128xi32>
      %73 = arith.cmpi eq, %71, %72 : vector<1x8x128xi32>
      %74 = vector.broadcast %55 : f32 to vector<1x8x128xf32>
      %75 = vector.broadcast %70 : f32 to vector<1x8x128xf32>
      %76 = arith.select %73, %74, %75 : vector<1x8x128xi1>, vector<1x8x128xf32>
      %c0_41 = arith.constant 0 : index
      %c0_42 = arith.constant 0 : index
      %c0_43 = arith.constant 0 : index
      %77 = vector.load %arg6[%c0_41, %c0_42, %c0_43] : memref<1x8x128xf32, #tpu.memory_space<vmem>>, vector<1x8x128xf32>
      tpu.vector_store %arg6[%c0_41, %c0_42, %c0_43], %76 {strides = array<i32>} : memref<1x8x128xf32, #tpu.memory_space<vmem>>, vector<1x8x128xf32>,
    } else {
    }
    return
  }
  func.func @transform_0(%arg0: i32, %arg1: i32) -> (i32, i32) {
    %c0_i32 = arith.constant 0 : i32
    return %arg0, %arg1 : i32, i32
  }
  func.func @transform_1(%arg0: i32, %arg1: i32) -> (i32, i32) {
    %c0_i32 = arith.constant 0 : i32
    %c0_i32_0 = arith.constant 0 : i32
    return %arg0, %c0_i32 : i32, i32
  }
  func.func @transform_2(%arg0: i32, %arg1: i32) -> (i32, i32) {
    %c0_i32 = arith.constant 0 : i32
    %c0_i32_0 = arith.constant 0 : i32
    %c0_i32_1 = arith.constant 0 : i32
    return %c0_i32, %c0_i32_0 : i32, i32
  }
  func.func @transform_3(%arg0: i32, %arg1: i32) -> (i32, i32) {
    %c0_i32 = arith.constant 0 : i32
    %c0_i32_0 = arith.constant 0 : i32
    %c0_i32_1 = arith.constant 0 : i32
    return %c0_i32, %c0_i32_0 : i32, i32
  }
  func.func @transform_4(%arg0: i32, %arg1: i32) -> (i32, i32, i32) {
    %c0_i32 = arith.constant 0 : i32
    %c0_i32_0 = arith.constant 0 : i32
    %c0_i32_1 = arith.constant 0 : i32
    return %arg0, %c0_i32, %c0_i32_0 : i32, i32, i32
  }
}

</mosaic_0001>

<bundles_post_ra>
// kernel: tpu_custom_call.1
= control target key start
LH: loop header
LB: loop body
LE: loop exit
PB: predicated region body
PF: predicated region fallthrough
CT: control target
= control target key end

     0   :  { %9 = vsyncpa [#allocation6], 0  ;;  %s762_s0 = inlined_call_operand.vmem [shape: f32[16,32], index: 0, kind: input, shape index: {}]   ;;  %s763_s1 = inlined_call_operand.vmem [shape: s32[16,1], index: 1, kind: input, shape index: {}]   ;;  %s764_s2 = inlined_call_operand.vmem [shape: f32[2,16], index: 2, kind: input, shape index: {}]   ;;  %s765_s3 = inlined_call_operand.vmem [shape: f32[2,16], index: 3, kind: input, shape index: {}]   ;;  %s766_s4 = inlined_call_operand.hbm [shape: f32[2,8,128], index: 4, kind: output, shape index: {}]  }
   0x1   :  { %11 = vsyncpa [#allocation6 + $0x1], 0  ;;  %s629_s15 = smov 0   ;;  %s631_s16 = smov 0  }
   0x2   :  { %s633_s17 = smov 0   ;;  %s635_s18 = smov 0  }
   0x3   :  { %s637_s19 = smov 0   ;;  %s639_s20 = smov 0  }
   0x4 LB: > { %s435_s21 = sadd.s32 4294967295, %s598_s20   ;;  %s436_s22 = sadd.s32 4294967294, %s598_s20   ;;  %s598_s20 = sphi %s639_s20, %s17_s20   ;;  %s594_s19 = sphi %s637_s19, %s773_s19   ;;  %s590_s18 = sphi %s635_s18, %s772_s18   ;;  %s586_s17 = sphi %s633_s17, %s771_s17   ;;  %s582_s16 = sphi %s631_s16, %s770_s16   ;;  %s578_s15 = sphi %s629_s15, %s769_s15  }
   0x5   : > { %s29_s23 = sadd.s32 1, %s594_s19  ;;  %s132_s24 = sadd.s32 1, %s586_s17 }
   0x6   : > { %p31_p0 = scmp.ge.s32.totalorder %s29_s23, 2  ;;  %p142_p1 = scmp.ne.s32.totalorder %s586_s17, %s582_s16 }
   0x7   : > { %p143_p2 = scmp.eq.s32.totalorder %s435_s21, 1  ;;  %p148_p3 = scmp.ne.s32.totalorder %s582_s16, %s578_s15 }
   0x8   : > { %s775_s23 = smov (%p31_p0, %s29_s23), 0  ;;  %p149_p5 = scmp.eq.s32.totalorder %s436_s22, 1 }
   0x9   : > { %p669_p4 = por %p143_p2, %p142_p1  ;;  %s129_s26 = ssub.s32 %s594_s19, %s775_s23 }
   0xa   : > { %p439_p6 = scmp.ge.s32.totalorder %s598_s20, 1  ;;  %p130_p7 = scmp.eq.s32.totalorder %s129_s26, 0 }
   0xb   : > { %p676_p8 = por %p149_p5, %p148_p3  ;;  %p190_p9 = scmp.lt.s32.totalorder %s598_s20, 3 }
   0xc   : > { %s682_s28 = scalar_select %p130_p7, %s586_s17, %s132_s24  }
   0xd   : > { %p191_p10 = pnand %p439_p6, %p190_p9 }
   0xe   : > { %p222_p11 = scmp.lt.s32.totalorder (!%p191_p10), %s590_s18, 1  ;;  %vm237_vm0 = vcmask (!%p191_p10), 7168   ;;  %v600_v0 = vmov (!%p191_p10), -inf   ;;  %vm253_vm1 = vcmask (!%p191_p10), 261120   ;;  %v601_v3 = vmov (!%p191_p10), 0   ;;  %s443_s21 = sshll.u32 (!%p191_p10), %s590_s18, 3 }
   0xf   : > { %194 = sbr.rel (%p191_p10) target bundleno = 711 (0x2c7), region = 36  ;;  %238 = vst.msk [vmem:[#allocation2] sm:$0xff] (!%p191_p10), %vm237_vm0, %v600_v0  ;;  %510 = vset.pattern.permute.xlu0 (!%p191_p10), %v601_v3  ;;  %511 = vset.pattern.permute.xlu1 (!%p191_p10), %v601_v3  ;;  %v602_v5 = vmov (!%p191_p10), 0.0   ;;  %v244_v13 = vlaneseq (!%p191_p10)  ;;  %v313_v20 = vld [vmem:[%s765_s3] sm:$0x3] (!%p191_p10)  ;;  %vm320_vm3 = vcmask (!%p191_p10), 123904   ;;  %v291_v40 = vstv (!%p191_p10), %s443_s21 }
  0x10   : > { %239 = vst.msk [vmem:[#allocation3] sm:$0xff] (!%p191_p10), %vm237_vm0, %v602_v5  ;;  %240 = vst.msk [vmem:[#allocation4] sm:$0xff] (!%p191_p10), %vm237_vm0, %v602_v5  ;;  %v317_v21 = vmul.f32 (!%p191_p10), 1.442695, %v313_v20  ;;  %v312_v22 = vld [vmem:[%s764_s2] sm:$0x3] (!%p191_p10) }
  0x11   : > { %v245_v14 = vand.u32 (!%p191_p10), 127, %v244_v13  ;;  %v314_v23 = vadd.f32 (!%p191_p10), 1.0, %v313_v20  ;;  %v315_v24 = vmul.f32 (!%p191_p10), %v312_v22, %v312_v22  ;;  %v290_v39 = vshrl.u32 (!%p191_p10), %v244_v13, 7  ;;  %s219_s22 = sand.u32 (!%p191_p10), 1, %s582_s16   ;;  %p332_p12 = scmp.eq.s32.totalorder (!%p191_p10), %s590_s18, 0 }
  0x12   : > { %s440_s24 = sshll.u32 (!%p191_p10), %s219_s22, 3  ;;  %s445_s5 = sshll.u32 (!%p191_p10), %s590_s18, 7 }
  0x13   : > { %v316_v25 = vsub.f32 (!%p191_p10), %v314_v23, %v315_v24  ;;  %v292_v42 = vadd.s32 (!%p191_p10), %v291_v40, %v290_v39  ;;  %s221_s6 = scalar_lea.vmem (!%p191_p10), [#allocation5], %s440_s24  ;;  %vm334_vm5 = vcmp.eq.s32.totalorder (!%p191_p10), %v290_v39, 0  ;;  %s340_s11 = scalar_lea.sflag (!%p191_p10), [#allocation6], %s219_s22 }
  0x14   : > { %s603_s12 = smov (!%p191_p10), [#allocation5]  }
  0x15   : > { %vm300_vm4 = vcmp.lt.s32.totalorder (!%p191_p10), %v292_v42, 16  ;;  %s524_s13 = sshll.u32 (!%p191_p10), %s603_s12, 4  ;;  %s525_s13 = int_to_ptr.vmem [resolvable:$false] %s524_s13 }
  0x16   : > { %s223_s29 = scalar_select %p222_p11, %s590_s18, 1  ;;  %v264_v6 = vld [vmem:[#allocation2] sm:$0xff] }
  0x17   : > { %v266_v31 = vld [vmem:[#allocation3] sm:$0xff]  ;;  %v257_v35 = vld [vmem:[#allocation4] sm:$0xff]  ;;  %s526_s14 = scalar_lea.vmem %s525_s13, 256 }
  0x18   : > { %s441_s30 = sshll.u32 %s223_s29, 3 }
  0x19   : > { %s228_s7 = scalar_lea.vmem %s762_s0, %s441_s30  ;;  %s232_s10 = scalar_lea.vmem %s763_s1, %s441_s30 }
  0x1a   : > { %v241_v1 = vld [vmem:[%s228_s7] sm:$0xff]  ;;  %s353_s7 = sshll.u32 %s221_s6, 4  ;;  %s717_s7 = int_to_ptr.vmem [resolvable:$true] %s353_s7 }
  0x1b   : > { %v261_v2 = vsel %vm253_vm1, %v241_v1, -inf  ;;  %v242_v4 = vld [vmem:[%s232_s10] sm:$0xff]  ;;  %s715_s10 = scalar_lea.hbm %s766_s4, %s445_s5  ;;  %s520_s18 = scalar_lea.vmem %s717_s7, 128 }
  0x1c   : > { %262 = vmax.xlane.f32.xlu0 %v261_v2  ;;  %249 = vperm.xlu1 %511, %v242_v4   ;;  %p521_p13 = scmp.ne.s32.totalorder %s717_s7, %s520_s18  ;;  %p527_p2 = scmp.lt.s32.totalorder %s717_s7, %s525_s13 }
  0x1d   : > { %p528_p3 = scmp.lt.s32.totalorder %s526_s14, %s520_s18 }
  0x1e   : > { %p522_p0 = pnand %p521_p13, %p669_p4 }
  0x1f   : > { %p529_p5 = por %p528_p3, %p527_p2 }
  0x20   : > { %p523_p1 = pneg %p522_p0 }
  0x22   : > { %p530_p6 = pnand %p529_p5, %p523_p1 }
  0x9b   : > { %v250_v15 = vpop.permute.xlu1 %249 }
  0x9c   : > { %vm251_vm2 = vcmp.eq.s32.totalorder %v245_v14, %v250_v15 }
  0x9d   : > { %v252_v17 = vsel %vm251_vm2, %v241_v1, 0.0 }
  0x9e   : > { %v254_v19 = vsel %vm253_vm1, %v252_v17, 0.0 }
  0xa9   : > { %v263_v7 = vpop.xlane.xlu0 %262 }
  0xaa   : > { %v265_v8 = vmax.f32 %v264_v6, %v263_v7 }
  0xac   : > { %v267_v9 = vsub.f32 %v264_v6, %v265_v8  ;;  %284 = vst.msk [vmem:[#allocation2] sm:$0xff] %vm237_vm0, %v265_v8  ;;  %273 = vperm.xlu0 %510, %v265_v8  }
  0xae   : > { %v268_v29 = vmul.f32 1.442695, %v267_v9 }
  0xb3   : > { %v293_v44 = vld [vmem:[#allocation2] sm:$0xff] }
 0x12b   : > { %v274_v10 = vpop.permute.xlu0 %273 }
 0x12c   : > { %v276_v11 = vsub.f32 %v241_v1, %v274_v10 }
 0x12e   : > { %v277_v12 = vmul.f32 1.442695, %v276_v11 }
 0x130   : > { %512 = vpow2.f32 %v277_v12 }
 0x131   : > { %514 = vpow2.f32 %v317_v21 }
 0x132   : > { %516 = vpow2.f32 %v268_v29 }
 0x13a   : > { %v513_v16 = vpop.eup %512 }
 0x13b   : > { %v279_v18 = vsel %vm253_vm1, %v513_v16, 0.0  ;;  %v515_v26 = vpop.eup %514 }
 0x13c   : > { %280 = vadd.xlane.f32.xlu1 %v279_v18  ;;  %v319_v27 = vsub.f32 %v316_v25, %v515_v26  ;;  %v517_v30 = vpop.eup %516 }
 0x13d   : > { %v270_v32 = vmul.f32 %v517_v30, %v266_v31 }
 0x13e   : > { %v321_v28 = vsel %vm320_vm3, %v319_v27, 0.0 }
 0x13f   : > { %322 = vadd.xlane.f32.xlu0 %v321_v28 }
 0x140   : > { %255 = vadd.xlane.f32.xlu1 %v254_v19 }
 0x1c9   : > { %v281_v33 = vpop.xlane.xlu1 %280 }
 0x1ca   : > { %v282_v34 = vadd.f32 %v281_v33, %v270_v32 }
 0x1cc   : > { %283 = vst.msk [vmem:[#allocation3] sm:$0xff] %vm237_vm0, %v282_v34  ;;  %v323_v50 = vpop.xlane.xlu0 %322 }
 0x1cd   : > { %v256_v36 = vpop.xlane.xlu1 %255  ;;  %v324_v51 = vrot.slane %v323_v50, 4 }
 0x1ce   : > { %v258_v37 = vadd.f32 %v257_v35, %v256_v36 }
 0x1cf   : > { %v325_v52 = vadd.f32 %v324_v51, %v323_v50 }
 0x1d0   : > { %260 = vst.msk [vmem:[#allocation4] sm:$0xff] %vm237_vm0, %v258_v37 }
 0x1d1   : > { %v326_v53 = vrot.slane %v325_v52, 2 }
 0x1d3   : > { %v294_v38 = vld [vmem:[#allocation3] sm:$0xff]  ;;  %v327_v57 = vadd.f32 %v326_v53, %v325_v52 }
 0x1d4   : > { %518 = vlog2.f32 %v294_v38 }
 0x1d5   : > { %v328_v60 = vrot.slane %v327_v57, 1 }
 0x1d7   : > { %v298_v45 = vld [vmem:[#allocation4] sm:$0xff]  ;;  %v329_v63 = vadd.f32 %v328_v60, %v327_v57 }
 0x1de   : > { %v519_v41 = vpop.eup %518 }
 0x1df   : > { %v296_v43 = vmul.f32 0.6931472, %v519_v41 }
 0x1e1   : > { %v297_v46 = vadd.f32 %v296_v43, %v293_v44 }
 0x1e3   : > { %v299_v47 = vsub.f32 %v297_v46, %v298_v45 }
 0x1e5   : > { %v301_v48 = vsel %vm300_vm4, %v299_v47, 0.0 }
 0x1e6   : > { %v302_v49 = vsel %vm237_vm0, %v301_v48, 0.0 }
 0x1e7   : > { %303 = vadd.xlane.f32.xlu1 %v302_v49 }
 0x274   : > { %v304_v54 = vpop.xlane.xlu1 %303 }
 0x275   : > { %v305_v55 = vrot.slane %v304_v54, 4 }
 0x277   : > { %v306_v56 = vadd.f32 %v305_v55, %v304_v54 }
 0x279   : > { %v307_v58 = vrot.slane %v306_v56, 2 }
 0x27b   : > { %v308_v59 = vadd.f32 %v307_v58, %v306_v56 }
 0x27d   : > { %v309_v61 = vrot.slane %v308_v59, 1 }
 0x27f   : > { %v310_v62 = vadd.f32 %v309_v61, %v308_v59 }
 0x281   : > { %448 = vpush %v310_v62 }
 0x282   : > { %450 = vpush %v329_v63 }
 0x2b2   : > { %s449_s26 = spop %448 }
 0x2b3   : > { %s451_s29 = spop %450  ;;  %v335_v0 = vstv %s449_s26 }
 0x2b4   : > { %s331_s30 = smul.f32 -0.5, %s451_s29 }
 0x2b6   : > { %s777_s30 = smov (!%p332_p12, %s331_s30), 0.0 }
 0x2b7   : > { %v336_v1 = vstv %s777_s30 }
 0x2b8   : > { %v337_v2 = vsel %vm334_vm5, %v335_v0, %v336_v1 }
 0x2b9   : > { %338 = vst [vmem:[%s221_s6] sm:$0xff] %v337_v2 }
 0x2ba   : > { %533 = shalt.err (!%p530_p6)
}
 0x2bb   : > { %s534_s21 = scalar_lea.hbm %s715_s10, 128  ;;  %s538_s26 = scalar_lea.hbm %s766_s4, 256 }
 0x2bc   : > { %p535_p7 = scmp.ne.s32.totalorder %s715_s10, %s534_s21  ;;  %p539_p11 = scmp.lt.u32.totalorder %s715_s10, %s766_s4 }
 0x2bd   : > { %p540_p12 = scmp.lt.u32.totalorder %s538_s26, %s534_s21  ;;  %p542_p0 = scmp.lt.u32.totalorder %s534_s21, %s715_s10 }
 0x2be   : > { %p536_p9 = pnand %p535_p7, %p669_p4 }
 0x2bf   : > { %p541_p13 = por %p540_p12, %p539_p11 }
 0x2c0   : > { %p537_p10 = pneg %p536_p9 }
 0x2c1   : > { %p543_p1 = por %p542_p0, %p541_p13 }
 0x2c3   : > { %p544_p2 = pnand %p543_p1, %p537_p10 }
 0x2c5   : > { %547 = shalt.err (!%p544_p2)
}
 0x2c6   : > { %452 = dma.vmem_to_hbm [thread:$0]  (%p669_p4), %s717_s7, 128, %s715_s10, %s340_s11  }
 0x2c7 PF: > { %p458_p3 = scmp.ge.s32.totalorder %s598_s20, 2  ;;  %s365_s5 = sand.u32 1, %s578_s15  }
 0x2c8   : > { %s366_s6 = scalar_lea.sflag [#allocation6], %s365_s5 }
 0x2c9   : > { %p455_p5 = pnand %p458_p3, %p676_p8 }
 0x2cb   : > { %573 = dma.done.wait (!%p455_p5), %s366_s6, 128  }
 0x2cc   : > { %575 = vsyncadd (!%p455_p5), %s366_s6, 4294967168  ;;  %s17_s20 = sadd.s32 1, %s598_s20   ;;  %s769_s15 = smov %s582_s16 }
 0x2cd   : > { %p14_p6 = scmp.ge.s32.totalorder %s17_s20, 4   ;;  %s770_s16 = smov %s586_s17 }
 0x2ce   : > { %s771_s17 = smov %s682_s28  ;;  %s772_s18 = smov %s594_s19 }
 0x2cf   : > { %s773_s19 = smov %s775_s23  ;;  %16 = sbr.rel (!%p14_p6) target bundleno = 4 (0x4), region = 82 }
 0x2d6   :  { %371 = vsyncpa [#allocation6], 1 }
 0x2d7   :  { %373 = vsyncpa [#allocation6 + $0x1], 1 }

</bundles_post_ra>
